<compile_context>
chip_gen: v7x
topology: tpu7x:2x2x1
jax: 0.10.0
libtpu: 0.0.40
codegen_flags: <defaults>
</compile_context>

<pallas_src>
import jax
import jax.numpy as jnp
from jax.experimental import pallas as pl
from jax.experimental.pallas import tpu as pltpu

EPSILON = 1e-6


def _normalize_kernel(x_ref, alpha_ref, bias_ref, o_ref):
    # x_ref: (TM, D) tile of rows; alpha_ref/bias_ref: (1, D)
    x = x_ref[...].astype(jnp.float32)
    d = x.shape[-1]

    mean = jnp.mean(x, axis=-1, keepdims=True)
    centered = x - mean
    # torch.Tensor.std default is unbiased (ddof=1); guard d == 1 against /0.
    denom = d - 1 if d > 1 else 1
    var = jnp.sum(centered * centered, axis=-1, keepdims=True) * (1.0 / denom)
    std = jnp.sqrt(var)

    # EUP reciprocal on the (TM, 1) vector; broadcast becomes a cheap vmul.
    inv = pl.reciprocal(std + EPSILON, approx=False)

    alpha = alpha_ref[...].astype(jnp.float32)
    bias = bias_ref[...].astype(jnp.float32)

    o_ref[...] = (alpha * (centered * inv) + bias).astype(o_ref.dtype)


def _choose_tile_rows(rows, D, dtype):
    """Pick a row-tile size: multi-MiB blocks, sublane-aligned, v7x-VMEM-safe."""
    itemsize = jnp.dtype(dtype).itemsize
    # Sublane packing multiple for the input dtype (block is in input dtype).
    sub = {4: 8, 2: 16, 1: 32}.get(itemsize, 8)

    # Target ~8 MiB per block -> double-buffered in + out ~= 32 MiB, which
    # leaves headroom on v7x (64 MiB VMEM/TC) and easily fits v5e/v6e.
    target_bytes = 8 * 1024 * 1024
    tr = max(sub, target_bytes // max(1, D * itemsize))
    tr = (tr // sub) * sub

    # Don't exceed the (sublane-rounded) number of rows.
    rows_cap = ((rows + sub - 1) // sub) * sub
    tr = min(tr, rows_cap)

    # Prefer >= 2 grid steps when the problem is big enough (megacore on v7x).
    if rows > 2 * sub:
        half = ((pl.cdiv(rows, 2) + sub - 1) // sub) * sub
        tr = min(tr, half)

    return max(tr, sub)


def normalize_layer(x, alpha, bias, *, tile_rows=None):
    """x: (..., D); alpha, bias: (D,). Normalizes along last axis."""
    # TODO(synk): for tiny D (< 128 lanes) the lane dimension is underfilled;
    # a lane-dense repack (fold rows into lanes) would be needed for peak BW.
    orig_shape = x.shape
    D = orig_shape[-1]
    rows = 1
    for s in orig_shape[:-1]:
        rows *= s
    x2 = x.reshape(rows, D)
    alpha2 = alpha.reshape(1, D)
    bias2 = bias.reshape(1, D)

    if tile_rows is None:
        tile_rows = _choose_tile_rows(rows, D, x2.dtype)

    grid = (pl.cdiv(rows, tile_rows),)  # ragged last block is masked on writeback

    out = pl.pallas_call(
        _normalize_kernel,
        out_shape=jax.ShapeDtypeStruct((rows, D), x.dtype),
        grid_spec=pltpu.PrefetchScalarGridSpec(
            num_scalar_prefetch=0,
            grid=grid,
            in_specs=[
                pl.BlockSpec((tile_rows, D), lambda i: (i, 0)),
                pl.BlockSpec((1, D), lambda i: (0, 0)),
                pl.BlockSpec((1, D), lambda i: (0, 0)),
            ],
            out_specs=pl.BlockSpec((tile_rows, D), lambda i: (i, 0)),
        ),
        compiler_params=pltpu.CompilerParams(
            dimension_semantics=("parallel",),
            vmem_limit_bytes=64 << 20,
        ),
    )(x2, alpha2, bias2)

    return out.reshape(orig_shape)


def normalize_reference(x, alpha, bias):
    xf = x.astype(jnp.float32)
    mean = jnp.mean(xf, axis=-1, keepdims=True)
    std = jnp.std(xf, axis=-1, keepdims=True, ddof=1)
    return (alpha * (xf - mean) / (std + EPSILON) + bias).astype(x.dtype)


if __name__ == "__main__":
    key = jax.random.PRNGKey(0)
    batch, seq, hidden = 2, 8, 32

    x = jax.random.normal(key, (batch, seq, hidden), dtype=jnp.float32)
    # deterministic parameter init matching nn.Parameter(torch.ones / torch.zeros)
    alpha = jnp.ones((hidden,), dtype=jnp.float32)
    bias = jnp.zeros((hidden,), dtype=jnp.float32)

    out = normalize_layer(x, alpha, bias)
    out = jax.block_until_ready(out)

    ref = normalize_reference(x, alpha, bias)
    assert out.shape == x.shape
    assert jnp.allclose(out, ref, atol=1e-5, rtol=1e-5), "mismatch vs reference"

    # Also exercise a ragged-row case (rows % tile_rows != 0 path) at small scale.
    x2 = jax.random.normal(jax.random.PRNGKey(1), (3, 5, hidden), dtype=jnp.float32)
    out2 = jax.block_until_ready(normalize_layer(x2, alpha, bias, tile_rows=8))
    ref2 = normalize_reference(x2, alpha, bias)
    assert jnp.allclose(out2, ref2, atol=1e-5, rtol=1e-5), "ragged mismatch"

    print("KERNEL_OK")
</pallas_src>

<mosaic_0001>
module attributes {stable_mosaic.version = 11 : i64} {
  func.func @_normalize_kernel(%arg0: i32, %arg1: memref<16x32xf32, #tpu.memory_space<vmem>>, %arg2: memref<1x32xf32, #tpu.memory_space<vmem>>, %arg3: memref<1x32xf32, #tpu.memory_space<vmem>>, %arg4: memref<16x32xf32, #tpu.memory_space<vmem>>) attributes {dimension_semantics = [#tpu.dimension_semantics<parallel>], iteration_bounds = array<i64: 1>, scalar_prefetch = 0 : i64, scratch_operands = 0 : i64, tpu.core_type = #tpu.core_type<tc>, window_params = [{transform_indices = @transform_0, window_bounds = array<i64: 16, 32>}, {pipeline_mode = #tpu.pipeline_mode<synchronous>, transform_indices = @transform_1, window_bounds = array<i64: 1, 32>}, {pipeline_mode = #tpu.pipeline_mode<synchronous>, transform_indices = @transform_2, window_bounds = array<i64: 1, 32>}, {transform_indices = @transform_3, window_bounds = array<i64: 16, 32>}]} {
    %c0 = arith.constant 0 : index
    %c0_0 = arith.constant 0 : index
    %0 = vector.load %arg1[%c0, %c0_0] : memref<16x32xf32, #tpu.memory_space<vmem>>, vector<16x32xf32>
    %cst = arith.constant dense<0.000000e+00> : vector<16xf32>
    %1 = vector.multi_reduction <add>, %0, %cst [1] : vector<16x32xf32> to vector<16xf32>
    %2 = vector.shape_cast %1 : vector<16xf32> to vector<16x1xf32>
    %cst_1 = arith.constant 3.200000e+01 : f32
    %3 = vector.broadcast %cst_1 : f32 to vector<16x1xf32>
    %4 = arith.divf %2, %3 : vector<16x1xf32>
    %5 = vector.broadcast %4 : vector<16x1xf32> to vector<16x32xf32>
    %6 = arith.subf %0, %5 : vector<16x32xf32>
    %7 = arith.mulf %6, %6 : vector<16x32xf32>
    %cst_2 = arith.constant dense<0.000000e+00> : vector<16xf32>
    %8 = vector.multi_reduction <add>, %7, %cst_2 [1] : vector<16x32xf32> to vector<16xf32>
    %9 = vector.shape_cast %8 : vector<16xf32> to vector<16x1xf32>
    %cst_3 = arith.constant 0.0322580636 : f32
    %10 = vector.broadcast %cst_3 : f32 to vector<16x1xf32>
    %11 = arith.mulf %9, %10 : vector<16x1xf32>
    %12 = math.sqrt %11 : vector<16x1xf32>
    %cst_4 = arith.constant 9.99999997E-7 : f32
    %13 = vector.broadcast %cst_4 : f32 to vector<16x1xf32>
    %14 = arith.addf %12, %13 : vector<16x1xf32>
    %15 = tpu.reciprocal %14 : vector<16x1xf32> -> vector<16x1xf32>
    %c0_5 = arith.constant 0 : index
    %c0_6 = arith.constant 0 : index
    %16 = vector.load %arg2[%c0_5, %c0_6] : memref<1x32xf32, #tpu.memory_space<vmem>>, vector<1x32xf32>
    %c0_7 = arith.constant 0 : index
    %c0_8 = arith.constant 0 : index
    %17 = vector.load %arg3[%c0_7, %c0_8] : memref<1x32xf32, #tpu.memory_space<vmem>>, vector<1x32xf32>
    %18 = vector.broadcast %15 : vector<16x1xf32> to vector<16x32xf32>
    %19 = arith.mulf %6, %18 : vector<16x32xf32>
    %20 = vector.broadcast %16 : vector<1x32xf32> to vector<16x32xf32>
    %21 = arith.mulf %20, %19 : vector<16x32xf32>
    %22 = vector.broadcast %17 : vector<1x32xf32> to vector<16x32xf32>
    %23 = arith.addf %21, %22 : vector<16x32xf32>
    %c0_9 = arith.constant 0 : index
    %c0_10 = arith.constant 0 : index
    %24 = vector.load %arg4[%c0_9, %c0_10] : memref<16x32xf32, #tpu.memory_space<vmem>>, vector<16x32xf32>
    tpu.vector_store %arg4[%c0_9, %c0_10], %23 {strides = array<i32>} : memref<16x32xf32, #tpu.memory_space<vmem>>, vector<16x32xf32>,
    return
  }
  func.func @transform_0(%arg0: i32) -> (i32, i32) {
    %c0_i32 = arith.constant 0 : i32
    %c0_i32_0 = arith.constant 0 : i32
    return %arg0, %c0_i32 : i32, i32
  }
  func.func @transform_1(%arg0: i32) -> (i32, i32) {
    %c0_i32 = arith.constant 0 : i32
    %c0_i32_0 = arith.constant 0 : i32
    %c0_i32_1 = arith.constant 0 : i32
    return %c0_i32, %c0_i32_0 : i32, i32
  }
  func.func @transform_2(%arg0: i32) -> (i32, i32) {
    %c0_i32 = arith.constant 0 : i32
    %c0_i32_0 = arith.constant 0 : i32
    %c0_i32_1 = arith.constant 0 : i32
    return %c0_i32, %c0_i32_0 : i32, i32
  }
  func.func @transform_3(%arg0: i32) -> (i32, i32) {
    %c0_i32 = arith.constant 0 : i32
    %c0_i32_0 = arith.constant 0 : i32
    return %arg0, %c0_i32 : i32, i32
  }
}

</mosaic_0001>

<bundles_post_ra>
// kernel: tpu_custom_call.1
= control target key start
LH: loop header
LB: loop body
LE: loop exit
PB: predicated region body
PF: predicated region fallthrough
CT: control target
= control target key end

     0   :  { %8 = vsyncpa [#allocation3], 0  ;;  %s337_s0 = inlined_call_operand.hbm [shape: f32[16,32], index: 0, kind: input, shape index: {}]   ;;  %s338_s1 = inlined_call_operand.hbm [shape: f32[1,32], index: 1, kind: input, shape index: {}]   ;;  %s339_s2 = inlined_call_operand.hbm [shape: f32[1,32], index: 2, kind: input, shape index: {}]   ;;  %s340_s3 = inlined_call_operand.hbm [shape: f32[16,32], index: 3, kind: output, shape index: {}]  }
   0x1   :  { %9 = vsyncpa [#allocation6], 0 }
   0x2   :  { %10 = vsyncpa [#allocation4], 0  ;;  %s244_s12 = smov [#allocation5]   ;;  %s245_s14 = smov [#allocation2]  }
   0x3   :  { %s29_s13 = sshll.u32 %s244_s12, 4  ;;  %s16_s15 = sshll.u32 %s245_s14, 4  ;;  %s30_s13 = int_to_ptr.vmem [resolvable:$true] %s29_s13  ;;  %s270_s15 = int_to_ptr.vmem [resolvable:$true] %s16_s15 }
   0x4   :  { %s150_s18 = scalar_lea.hbm %s338_s1, 16 }
   0x5   :  { %p151_p0 = scmp.ne.s32.totalorder %s338_s1, %s150_s18  ;;  %p154_p1 = scmp.lt.u32.totalorder %s150_s18, %s338_s1 }
   0x7   :  { %p156_p2 = pnand %p154_p1, %p151_p0 }
   0x9   :  { %159 = shalt.err (!%p156_p2)
}
   0xa   :  { %s160_s23 = scalar_lea.vmem %s30_s13, 16  ;;  %s164_s24 = scalar_lea.vmem %s30_s13, 32 }
   0xb   :  { %p161_p3 = scmp.ne.s32.totalorder %s30_s13, %s160_s23  ;;  %p165_p4 = scmp.lt.s32.totalorder %s30_s13, %s30_s13 }
   0xc   :  { %p166_p5 = scmp.lt.s32.totalorder %s164_s24, %s160_s23 }
   0xe   :  { %p167_p6 = por %p166_p5, %p165_p4 }
  0x10   :  { %p168_p7 = pnand %p167_p6, %p161_p3 }
  0x12   :  { %171 = shalt.err (!%p168_p7)
}
  0x13   :  { %32 = dma.hbm_to_vmem [thread:$0]  %s338_s1, 16, %s30_s13, [#allocation6]  }
  0x14   :  { %s172_s29 = scalar_lea.hbm %s337_s0, 256 }
  0x15   :  { %p173_p8 = scmp.ne.s32.totalorder %s337_s0, %s172_s29  ;;  %p176_p9 = scmp.lt.u32.totalorder %s172_s29, %s337_s0 }
  0x17   :  { %p178_p10 = pnand %p176_p9, %p173_p8 }
  0x19   :  { %181 = shalt.err (!%p178_p10)
}
  0x1a   :  { %s182_s7 = scalar_lea.vmem %s270_s15, 256  ;;  %p187_p12 = scmp.lt.s32.totalorder %s270_s15, %s270_s15 }
  0x1b   :  { %p183_p11 = scmp.ne.s32.totalorder %s270_s15, %s182_s7  ;;  %p188_p13 = scmp.lt.s32.totalorder %s182_s7, %s182_s7 }
  0x1d   :  { %p189_p0 = por %p188_p13, %p187_p12 }
  0x1f   :  { %p190_p1 = pnand %p189_p0, %p183_p11 }
  0x21   :  { %193 = shalt.err (!%p190_p1)
}
  0x22   :  { %s246_s1 = smov 128   ;;  %s247_s8 = smov 8  }
  0x23   :  { %22 = dma.hbm_to_vmem [thread:$0]  %s337_s0, 256, %s270_s15, [#allocation3], %s246_s1, %s246_s1, %s247_s8  }
  0x24   :  { %s248_s11 = smov [#allocation7]   ;;  %s194_s16 = scalar_lea.hbm %s339_s2, 16 }
  0x25   :  { %s39_s12 = sshll.u32 %s248_s11, 4  ;;  %p195_p2 = scmp.ne.s32.totalorder %s339_s2, %s194_s16  ;;  %s40_s12 = int_to_ptr.vmem [resolvable:$true] %s39_s12 }
  0x26   :  { %p198_p3 = scmp.lt.u32.totalorder %s194_s16, %s339_s2 }
  0x28   :  { %p200_p4 = pnand %p198_p3, %p195_p2 }
  0x2a   :  { %203 = shalt.err (!%p200_p4)
}
  0x2b   :  { %s204_s21 = scalar_lea.vmem %s40_s12, 16  ;;  %s208_s0 = scalar_lea.vmem %s40_s12, 32 }
  0x2c   :  { %p205_p5 = scmp.ne.s32.totalorder %s40_s12, %s204_s21  ;;  %p209_p6 = scmp.lt.s32.totalorder %s40_s12, %s40_s12 }
  0x2d   :  { %p210_p7 = scmp.lt.s32.totalorder %s208_s0, %s204_s21 }
  0x2f   :  { %p211_p8 = por %p210_p7, %p209_p6 }
  0x31   :  { %p212_p9 = pnand %p211_p8, %p205_p5 }
  0x33   :  { %215 = shalt.err (!%p212_p9)
}
  0x34   :  { %42 = dma.hbm_to_vmem [thread:$0]  %s339_s2, 16, %s40_s12, [#allocation6]  }
  0x35   :  { %238 = dma.done.wait [#allocation3], 256  }
  0x36   :  { %239 = vsyncadd [#allocation3], 4294967040 }
  0x37   :  { %240 = dma.done.wait [#allocation6], 32  }
  0x38   :  { %241 = vsyncadd [#allocation6], 4294967264  ;;  %vm54_vm0 = vcmask 261120   ;;  %v52_v0 = vld [vmem:[#allocation2] sm:$0xff]  ;;  %v53_v1 = vld [vmem:[#allocation2 + $0x8] sm:$0xff]  ;;  %s249_s2 = smov [#allocation8]  }
  0x39   :  { %v55_v2 = vsel %vm54_vm0, %v52_v0, 0.0  ;;  %v58_v3 = vsel %vm54_vm0, %v53_v1, 0.0  ;;  %v134_v31 = vld [vmem:[#allocation5] ss:$0 sm:$0xff]  ;;  %v135_v33 = vld [vmem:[#allocation7] ss:$0 sm:$0xff] }
  0x3a   :  { %56 = vadd.xlane.f32.xlu0 %v55_v2  ;;  %s121_s23 = sshll.u32 %s249_s2, 4  ;;  %s122_s23 = int_to_ptr.vmem [resolvable:$true] %s121_s23 }
  0x3b   :  { %s216_s24 = scalar_lea.vmem %s122_s23, 256  ;;  %p221_p11 = scmp.lt.s32.totalorder %s122_s23, %s122_s23 }
  0x3c   :  { %p217_p10 = scmp.ne.s32.totalorder %s122_s23, %s216_s24  ;;  %p222_p12 = scmp.lt.s32.totalorder %s216_s24, %s216_s24 }
  0x3e   :  { %59 = vadd.xlane.f32.xlu0 %v58_v3  ;;  %p223_p13 = por %p222_p12, %p221_p11 }
  0x40   :  { %p224_p0 = pnand %p223_p13, %p217_p10 }
  0xc7   :  { %v57_v4 = vpop.xlane.xlu0 %56 }
  0xc8   :  { %v62_v5 = vmul.f32 0.03125, %v57_v4 }
  0xca   :  { %v64_v6 = vsub.f32 %v52_v0, %v62_v5 }
  0xcb   :  { %v60_v7 = vpop.xlane.xlu0 %59 }
  0xcc   :  { %v63_v8 = vmul.f32 0.03125, %v60_v7  ;;  %v66_v9 = vmul.f32 %v64_v6, %v64_v6 }
  0xce   :  { %v65_v10 = vsub.f32 %v53_v1, %v63_v8  ;;  %v68_v11 = vsel %vm54_vm0, %v66_v9, 0.0 }
  0xcf   :  { %69 = vadd.xlane.f32.xlu1 %v68_v11 }
  0xd0   :  { %v67_v12 = vmul.f32 %v65_v10, %v65_v10 }
  0xd2   :  { %v71_v13 = vsel %vm54_vm0, %v67_v12, 0.0 }
  0xd3   :  { %72 = vadd.xlane.f32.xlu1 %v71_v13 }
 0x15c   :  { %v70_v14 = vpop.xlane.xlu1 %69 }
 0x15d   :  { %v74_v15 = vmul.f32 0.032258064, %v70_v14 }
 0x15f   :  { %142 = vrsqrt.f32 %v74_v15  ;;  %vm78_vm1 = vcmp.eq.f32.partialorder %v74_v15, inf  ;;  %v81_v20 = vand.u32 2147483648, %v74_v15  ;;  %vm80_vm2 = vcmp.eq.f32.partialorder %v74_v15, 0.0 }
 0x160   :  { %v73_v16 = vpop.xlane.xlu1 %72 }
 0x161   :  { %v75_v17 = vmul.f32 0.032258064, %v73_v16 }
 0x163   :  { %144 = vrsqrt.f32 %v75_v17  ;;  %vm85_vm3 = vcmp.eq.f32.partialorder %v75_v17, inf  ;;  %v88_v26 = vand.u32 2147483648, %v75_v17  ;;  %vm87_vm4 = vcmp.eq.f32.partialorder %v75_v17, 0.0 }
 0x169   :  { %v143_v18 = vpop.eup %142 }
 0x16a   :  { %v77_v19 = vmul.f32 %v143_v18, %v74_v15 }
 0x16c   :  { %v79_v21 = vsel %vm78_vm1, %v74_v15, %v77_v19 }
 0x16d   :  { %v145_v22 = vpop.eup %144  ;;  %v82_v23 = vsel %vm80_vm2, %v81_v20, %v79_v21 }
 0x16e   :  { %v90_v24 = vadd.f32 1e-06, %v82_v23  ;;  %v84_v25 = vmul.f32 %v145_v22, %v75_v17 }
 0x170   :  { %146 = vrcp.f32 %v90_v24  ;;  %v86_v27 = vsel %vm85_vm3, %v75_v17, %v84_v25 }
 0x171   :  { %v89_v28 = vsel %vm87_vm4, %v88_v26, %v86_v27 }
 0x172   :  { %v91_v29 = vadd.f32 1e-06, %v89_v28 }
 0x174   :  { %148 = vrcp.f32 %v91_v29 }
 0x17a   :  { %v147_v30 = vpop.eup %146 }
 0x17b   :  { %v96_v32 = vmul.f32 %v147_v30, %v64_v6 }
 0x17d   :  { %v104_v34 = vmul.f32 %v134_v31, %v96_v32 }
 0x17e   :  { %v149_v35 = vpop.eup %148 }
 0x17f   :  { %v97_v36 = vmul.f32 %v149_v35, %v65_v10  ;;  %v112_v37 = vadd.f32 %v135_v33, %v104_v34 }
 0x181   :  { %v105_v38 = vmul.f32 %v134_v31, %v97_v36  ;;  %114 = vst.msk [vmem:[#allocation8] sm:$0xff] %vm54_vm0, %v112_v37 }
 0x183   :  { %v113_v39 = vadd.f32 %v135_v33, %v105_v38 }
 0x185   :  { %115 = vst.msk [vmem:[#allocation8 + $0x8] sm:$0xff] %vm54_vm0, %v113_v39 }
 0x186   :  { %227 = shalt.err (!%p224_p0)
}
 0x187   :  { %s228_s27 = scalar_lea.hbm %s340_s3, 256 }
 0x188   :  { %p229_p1 = scmp.ne.s32.totalorder %s340_s3, %s228_s27  ;;  %p232_p2 = scmp.lt.u32.totalorder %s228_s27, %s340_s3 }
 0x18a   :  { %p234_p3 = pnand %p232_p2, %p229_p1 }
 0x18c   :  { %237 = shalt.err (!%p234_p3)
}
 0x18d   :  { %127 = dma.vmem_to_hbm [thread:$0]  %s122_s23, 256, %s340_s3, [#allocation4], %s246_s1, %s246_s1, %s247_s8  }
 0x18e   :  { %242 = dma.done.wait [#allocation4], 256  }
 0x18f   :  { %243 = vsyncadd [#allocation4], 4294967040 }
 0x190   :  { %131 = vsyncpa [#allocation3], 1 }
 0x191   :  { %132 = vsyncpa [#allocation6], 1 }
 0x192   :  { %133 = vsyncpa [#allocation4], 1 }

</bundles_post_ra>
